<compile_context>
chip_gen: v7x
topology: tpu7x:2x2x1
jax: 0.10.0
libtpu: 0.0.40
codegen_flags: <defaults>
</compile_context>

<pallas_src>
import jax
import jax.numpy as jnp
from jax.experimental import pallas as pl
from jax.experimental.pallas import tpu as pltpu


# ------------------------------- helpers ---------------------------------- #

def _round_up(x: int, m: int) -> int:
    return ((x + m - 1) // m) * m


def _vmem_budget_bytes() -> int:
    """Per-generation scoped-VMEM budget (~75% of physical per-TC VMEM)."""
    try:
        cap = int(pltpu.get_tpu_info().vmem_capacity_bytes)
    except Exception:
        cap = 64 * 1024 * 1024  # conservative (v7x per-TC) fallback
    return int(0.75 * cap)


# ----------------------------- linear kernel ------------------------------ #

def _linear_kernel(x_ref, wt_ref, b_ref, o_ref):
    # bf16 operands straight into the MXU, f32 accumulation, bias added in f32.
    acc = jnp.dot(x_ref[...], wt_ref[...], preferred_element_type=jnp.float32)
    acc = acc + b_ref[...].astype(jnp.float32)
    o_ref[...] = acc.astype(o_ref.dtype)


def _linear_tile_bytes(n_pad: int, k: int, tn: int) -> int:
    # bf16 everywhere; double buffering already included (factor 2 per operand).
    return 2 * (n_pad * k + k * tn + tn + n_pad * tn) * 2


def _pick_out_tile(out_dim: int, k: int, n_pad: int, budget: int):
    """Pick (tile_n, padded_out_dim). Never a single full-out_dim block:
    out_dim is padded to a tile multiple; prefer >= 2 blocks (v7x: both TCs)."""
    out_pad_128 = _round_up(out_dim, 128)
    best = None
    for tn in (4096, 2048, 1024, 512, 256, 128):
        if tn > out_pad_128:
            continue
        out_pad = _round_up(out_dim, tn)
        if _linear_tile_bytes(n_pad, k, tn) > budget:
            continue
        if best is None:
            best = (tn, out_pad)
        if out_pad // tn >= 2:
            return tn, out_pad
    if best is not None:
        return best
    return 128, out_pad_128  # minimal tile; vmem_limit is capped at budget anyway


def pallas_linear_bf16(x, weight_t, bias):
    """x: (N, K) bf16, weight_t: (K, out) bf16 (pre-transposed), bias: (out,) bf16
    -> (N, out) bf16, f32 accumulation on the MXU."""
    n, k = x.shape
    out_dim = int(weight_t.shape[1])
    x = x.astype(jnp.bfloat16)

    # Pad rows to 16: full packed bf16 (16,128) sublane groups -> unmasked stores.
    n_pad = max(16, _round_up(n, 16))
    if n_pad != n:
        x = jnp.concatenate([x, jnp.zeros((n_pad - n, k), x.dtype)], axis=0)

    budget = _vmem_budget_bytes()
    tn, out_pad = _pick_out_tile(out_dim, k, n_pad, budget)

    wt = weight_t.astype(jnp.bfloat16)
    b2 = bias.reshape(1, out_dim).astype(jnp.bfloat16)
    if out_pad != out_dim:
        wt = jnp.pad(wt, ((0, 0), (0, out_pad - out_dim)))
        b2 = jnp.pad(b2, ((0, 0), (0, out_pad - out_dim)))

    grid = (out_pad // tn,)
    tile_bytes = _linear_tile_bytes(n_pad, k, tn)
    vmem_limit = int(min(budget, max(4 * 1024 * 1024, tile_bytes + (2 << 20))))

    out = pl.pallas_call(
        _linear_kernel,
        out_shape=jax.ShapeDtypeStruct((n_pad, out_pad), jnp.bfloat16),
        grid=grid,
        in_specs=[
            pl.BlockSpec((n_pad, k), lambda j: (0, 0)),   # x resident
            pl.BlockSpec((k, tn), lambda j: (0, j)),      # W streamed over out-dim
            pl.BlockSpec((1, tn), lambda j: (0, j)),      # bias streamed
        ],
        out_specs=pl.BlockSpec((n_pad, tn), lambda j: (0, j)),
        compiler_params=pltpu.CompilerParams(
            dimension_semantics=("parallel",),
            vmem_limit_bytes=vmem_limit,
        ),
    )(x, wt, b2)
    return out[:n, :out_dim]


# ----------------------------- gather kernel ------------------------------ #

_GATHER_ROWS = 32  # multiple of 16 -> full packed bf16 output tiles, 32 DMAs in flight


def _gather_kernel(ids_ref, table_hbm, o_ref, sems):
    # ids_ref: (L,) int32 in SMEM (scalar prefetch); table_hbm: (V, D) in HBM;
    # o_ref: (ROWS, D) pipelined output block in VMEM. Rows are DMA'd straight
    # into o_ref (no staging buffer, no VMEM->VMEM copy).
    base = pl.program_id(0) * _GATHER_ROWS
    copies = []
    for r in range(_GATHER_ROWS):                       # static unroll: concurrent DMAs
        row = ids_ref[base + r]
        cp = pltpu.make_async_copy(
            table_hbm.at[pl.ds(row, 1), :],
            o_ref.at[pl.ds(r, 1), :],
            sems.at[r],
        )
        cp.start()
        copies.append(cp)
    for cp in copies:
        cp.wait()
    # TODO(synk): cross-step prefetch (double-buffered manual output pipeline) would
    # additionally hide the HBM DMA latency of the first rows of each step.


def pallas_embedding_gather(ids, table):
    """ids: (L,) int32, table: (V, D) bf16 (HBM-resident) -> (L, D) bf16."""
    l = int(ids.shape[0])
    v, d = table.shape
    # bounds-safe (torch would error on OOB ids; we clamp — flagged to model owner)
    ids = jnp.clip(ids.astype(jnp.int32), 0, v - 1)
    l_pad = _round_up(max(l, _GATHER_ROWS), _GATHER_ROWS)
    if l_pad != l:
        ids = jnp.concatenate([ids, jnp.zeros((l_pad - l,), jnp.int32)], axis=0)

    itemsize = jnp.dtype(table.dtype).itemsize
    vmem_limit = int(max(4 * 1024 * 1024, 4 * _GATHER_ROWS * d * itemsize))

    out = pl.pallas_call(
        _gather_kernel,
        out_shape=jax.ShapeDtypeStruct((l_pad, d), table.dtype),
        grid_spec=pltpu.PrefetchScalarGridSpec(
            num_scalar_prefetch=1,
            grid=(l_pad // _GATHER_ROWS,),
            in_specs=[pl.BlockSpec(memory_space=pl.ANY)],          # table stays in HBM
            out_specs=pl.BlockSpec((_GATHER_ROWS, d), lambda i, ids: (i, 0)),
            scratch_shapes=[pltpu.SemaphoreType.DMA((_GATHER_ROWS,))],
        ),
        compiler_params=pltpu.CompilerParams(
            # iterations are independent (disjoint output blocks, read-only table)
            dimension_semantics=("parallel",),
            vmem_limit_bytes=vmem_limit,
        ),
    )(ids, table)
    return out[:l]


# ----------------------------- Generator port ----------------------------- #

class GeneratorPallas:
    """JAX/Pallas port of Generator.

    Texts are passed as pre-tokenized int32 id arrays (stand-in for the external
    HuggingFace tokenizer; the torch code already strips BOS via `[0, 1:]`, so the
    arrays here are the post-strip ids). The text_embedder is a deterministic
    synthetic embedding table (stand-in for lm.embed_tokens).
    """

    def __init__(self, key, *, dim_clip, dim_embedding, visual_prefix_length,
                 vocab_size, add_image=True, pad_id=0, eos_id=2):
        self.dim_clip = dim_clip
        self.dim_embedding = dim_embedding
        self.visual_prefix_length = visual_prefix_length
        self.add_image = add_image
        self.pad_id = pad_id
        self.eos_id = eos_id

        kw, kb, ke = jax.random.split(key, 3)
        out_dim = dim_embedding * visual_prefix_length
        # nn.Linear(dim_clip, dim_embedding * visual_prefix_length); bf16 storage on TPU.
        w = (jax.random.normal(kw, (out_dim, dim_clip), jnp.float32)
             * (1.0 / jnp.sqrt(dim_clip))).astype(jnp.bfloat16)
        self.linear_weight = w                              # (out, in) — torch orientation
        self.linear_weight_t = jnp.asarray(w.T)             # (in, out) — transposed ONCE at init
        self.linear_bias = (jax.random.normal(kb, (out_dim,), jnp.float32) * 0.01
                            ).astype(jnp.bfloat16)
        # text_embedder weight (vocab, dim_embedding), bf16 storage, gathered directly.
        self.embed_table = (jax.random.normal(ke, (vocab_size, dim_embedding), jnp.float32)
                            * 0.02).astype(jnp.bfloat16)

    # --- embedding lookups: single batched Pallas DMA-gather over all ids --- #
    def _embed_many(self, id_seqs):
        lengths = [int(s.shape[0]) for s in id_seqs]
        all_ids = jnp.concatenate(id_seqs, axis=0).astype(jnp.int32)
        gathered = pallas_embedding_gather(all_ids, self.embed_table)
        out, off = [], 0
        for n in lengths:
            out.append(gathered[off:off + n])
            off += n
        return out

    def _concat_image_text_embeddings_train(self, batch_pairs, batch_targets):
        B = len(batch_pairs)
        P, D = self.visual_prefix_length, self.dim_embedding

        # (1) all image projections in ONE Pallas matmul call
        img_proj_per_pair = []
        if self.add_image:
            img_feats = [jnp.asarray(img, jnp.bfloat16)
                         for pairs in batch_pairs for (img, _txt) in pairs]
            if img_feats:
                img_mat = jnp.stack(img_feats, axis=0)                    # (Nimg, dim_clip)
                proj = pallas_linear_bf16(img_mat, self.linear_weight_t,
                                          self.linear_bias)               # (Nimg, P*D)
                img_proj_per_pair = list(proj.reshape(-1, P, D))

        # (2) all token-id embeddings in ONE Pallas DMA-gather call
        lookup_seqs, tags = [], []
        target_ids_map = {}
        for i, pairs in enumerate(batch_pairs):
            for j, (_img, text_ids) in enumerate(pairs):
                lookup_seqs.append(jnp.asarray(text_ids, jnp.int32))
                tags.append(("text", i, j))
            tgt = jnp.concatenate([jnp.asarray(batch_targets[i], jnp.int32),
                                   jnp.array([self.eos_id], jnp.int32)])  # '+ </s>'
            target_ids_map[i] = tgt
            lookup_seqs.append(tgt)
            tags.append(("target", i, None))
        lookup_seqs.append(jnp.array([self.pad_id], jnp.int32))
        tags.append(("pad", None, None))
        embeds = self._embed_many(lookup_seqs)

        text_embeds, target_embeds = {}, {}
        pad_embed = None
        for tag, emb in zip(tags, embeds):
            kind, i, j = tag
            if kind == "text":
                text_embeds[(i, j)] = emb
            elif kind == "target":
                target_embeds[i] = emb
            else:
                pad_embed = emb                                           # (1, D)

        # (3) ragged concat + labels + right padding (host-side glue, like torch)
        # TODO(synk): for large batches this per-item slicing/concat should be replaced
        # with a single device-side segment-offset scatter into a padded (B, max_len, D)
        # buffer; kept as torch-equivalent Python bookkeeping here.
        batch_embeds, batch_labels = [], []
        img_idx = 0
        for i, pairs in enumerate(batch_pairs):
            item_feat = []
            for j, _ in enumerate(pairs):
                if self.add_image:
                    item_feat.append(img_proj_per_pair[img_idx])
                    img_idx += 1
                item_feat.append(text_embeds[(i, j)])
            item_feat.append(target_embeds[i])
            item_embeds = jnp.concatenate(item_feat, axis=0)
            batch_embeds.append(item_embeds)
            tgt = target_ids_map[i]
            before = jnp.full((item_embeds.shape[0] - tgt.shape[0],), -100, jnp.int32)
            batch_labels.append(jnp.concatenate([before, tgt], axis=0))

        max_len = max(int(e.shape[0]) for e in batch_embeds)
        inputs_embeds, labels, attention_mask = [], [], []
        for i in range(B):
            item_embeds, item_label = batch_embeds[i], batch_labels[i]
            n = int(item_embeds.shape[0])
            pad_num = max_len - n
            if pad_num > 0:
                pad_block = jnp.broadcast_to(pad_embed, (pad_num, D)).astype(item_embeds.dtype)
                inputs_embeds.append(jnp.concatenate([item_embeds, pad_block], axis=0))
                labels.append(jnp.concatenate(
                    [item_label, jnp.full((pad_num,), -100, jnp.int32)], axis=0))
                attention_mask.append(jnp.concatenate(
                    [jnp.ones((n,), jnp.int32), jnp.zeros((pad_num,), jnp.int32)]))
            else:
                inputs_embeds.append(item_embeds)
                labels.append(item_label)
                attention_mask.append(jnp.ones((max_len,), jnp.int32))
        return (jnp.stack(inputs_embeds, axis=0),
                jnp.stack(attention_mask, axis=0),
                jnp.stack(labels, axis=0))

    def forward(self, batch_pairs, batch_targets):
        inputs_embeds, attention_mask, labels = \
            self._concat_image_text_embeddings_train(batch_pairs, batch_targets)
        # TODO(synk): `self.lm(inputs_embeds=..., attention_mask=..., labels=...)` is an
        # external pretrained LM (llama/gpt) and is not part of this module's kernels.
        return inputs_embeds, attention_mask, labels


# --------------------------------- demo ----------------------------------- #

if __name__ == "__main__":
    key = jax.random.PRNGKey(0)
    dim_clip, dim_embedding, visual_prefix_length, vocab = 32, 32, 4, 64

    gen = GeneratorPallas(key, dim_clip=dim_clip, dim_embedding=dim_embedding,
                          visual_prefix_length=visual_prefix_length,
                          vocab_size=vocab, add_image=True, pad_id=0, eos_id=2)

    k1, k2, k3 = jax.random.split(jax.random.PRNGKey(0), 3)
    img0 = jax.random.normal(k1, (dim_clip,), jnp.float32).astype(jnp.bfloat16)
    img1 = jax.random.normal(k2, (dim_clip,), jnp.float32).astype(jnp.bfloat16)
    img2 = jax.random.normal(k3, (dim_clip,), jnp.float32).astype(jnp.bfloat16)

    # pre-tokenized, BOS already stripped (deterministic stand-in for the tokenizer)
    batch_pairs = [
        [(img0, jnp.array([5, 17, 23, 8, 41], jnp.int32)),
         (img1, jnp.array([9, 3, 30], jnp.int32))],
        [(img2, jnp.array([12, 7, 55, 6], jnp.int32))],
    ]
    batch_targets = [jnp.array([21, 33, 4, 10], jnp.int32),
                     jnp.array([44, 2, 18, 9, 27, 5], jnp.int32)]

    inputs_embeds, attention_mask, labels = jax.block_until_ready(
        gen.forward(batch_pairs, batch_targets))

    # correctness checks of the Pallas hot paths against pure-JAX references
    img_mat = jnp.stack([img0, img1, img2], 0)
    ref_proj = (img_mat.astype(jnp.float32) @ gen.linear_weight_t.astype(jnp.float32)
                + gen.linear_bias.astype(jnp.float32)).astype(jnp.bfloat16)
    pal_proj = pallas_linear_bf16(img_mat, gen.linear_weight_t, gen.linear_bias)
    assert jnp.allclose(ref_proj.astype(jnp.float32), pal_proj.astype(jnp.float32),
                        atol=1e-2, rtol=1e-2)

    ids = jnp.array([5, 17, 0, 2, 63, 1, 40, 7, 8, 9], jnp.int32)
    ref_gather = gen.embed_table[ids]
    pal_gather = pallas_embedding_gather(ids, gen.embed_table)
    assert jnp.array_equal(ref_gather, pal_gather)

    assert inputs_embeds.shape[0] == 2 and inputs_embeds.shape[2] == dim_embedding
    assert attention_mask.shape == inputs_embeds.shape[:2]
    assert labels.shape == inputs_embeds.shape[:2]
    print("KERNEL_OK")
</pallas_src>

<mosaic_0001>
module attributes {stable_mosaic.version = 11 : i64} {
  func.func @_linear_kernel(%arg0: i32, %arg1: memref<16x32xbf16, #tpu.memory_space<vmem>>, %arg2: memref<32x128xbf16, #tpu.memory_space<vmem>>, %arg3: memref<1x128xbf16, #tpu.memory_space<vmem>>, %arg4: memref<16x128xbf16, #tpu.memory_space<vmem>>) attributes {dimension_semantics = [#tpu.dimension_semantics<parallel>], iteration_bounds = array<i64: 1>, scalar_prefetch = 0 : i64, scratch_operands = 0 : i64, tpu.core_type = #tpu.core_type<tc>, window_params = [{pipeline_mode = #tpu.pipeline_mode<synchronous>, transform_indices = @transform_0, window_bounds = array<i64: 16, 32>}, {transform_indices = @transform_1, window_bounds = array<i64: 32, 128>}, {transform_indices = @transform_2, window_bounds = array<i64: 1, 128>}, {transform_indices = @transform_3, window_bounds = array<i64: 16, 128>}]} {
    %c0 = arith.constant 0 : index
    %c0_0 = arith.constant 0 : index
    %0 = vector.load %arg1[%c0, %c0_0] : memref<16x32xbf16, #tpu.memory_space<vmem>>, vector<16x32xbf16>
    %c0_1 = arith.constant 0 : index
    %c0_2 = arith.constant 0 : index
    %1 = vector.load %arg2[%c0_1, %c0_2] : memref<32x128xbf16, #tpu.memory_space<vmem>>, vector<32x128xbf16>
    %cst = arith.constant dense<0.000000e+00> : vector<16x128xf32>
    %2 = tpu.matmul %0, %1, %cst {dimension_numbers = #tpu.dot_dimension_numbers<[1], [0], [0], [1], [0, 0, 1, 1], [], []>} : vector<16x32xbf16>, vector<32x128xbf16>, vector<16x128xf32> -> vector<16x128xf32>
    %c0_3 = arith.constant 0 : index
    %c0_4 = arith.constant 0 : index
    %3 = vector.load %arg3[%c0_3, %c0_4] : memref<1x128xbf16, #tpu.memory_space<vmem>>, vector<1x128xbf16>
    %4 = arith.extf %3 : vector<1x128xbf16> to vector<1x128xf32>
    %5 = vector.broadcast %4 : vector<1x128xf32> to vector<16x128xf32>
    %6 = arith.addf %2, %5 : vector<16x128xf32>
    %7 = arith.truncf %6 : vector<16x128xf32> to vector<16x128xbf16>
    %c0_5 = arith.constant 0 : index
    %c0_6 = arith.constant 0 : index
    %8 = vector.load %arg4[%c0_5, %c0_6] : memref<16x128xbf16, #tpu.memory_space<vmem>>, vector<16x128xbf16>
    tpu.vector_store %arg4[%c0_5, %c0_6], %7 {strides = array<i32>} : memref<16x128xbf16, #tpu.memory_space<vmem>>, vector<16x128xbf16>,
    return
  }
  func.func @transform_0(%arg0: i32) -> (i32, i32) {
    %c0_i32 = arith.constant 0 : i32
    %c0_i32_0 = arith.constant 0 : i32
    %c0_i32_1 = arith.constant 0 : i32
    return %c0_i32, %c0_i32_0 : i32, i32
  }
  func.func @transform_1(%arg0: i32) -> (i32, i32) {
    %c0_i32 = arith.constant 0 : i32
    %c0_i32_0 = arith.constant 0 : i32
    return %c0_i32, %arg0 : i32, i32
  }
  func.func @transform_2(%arg0: i32) -> (i32, i32) {
    %c0_i32 = arith.constant 0 : i32
    %c0_i32_0 = arith.constant 0 : i32
    return %c0_i32, %arg0 : i32, i32
  }
  func.func @transform_3(%arg0: i32) -> (i32, i32) {
    %c0_i32 = arith.constant 0 : i32
    %c0_i32_0 = arith.constant 0 : i32
    return %c0_i32, %arg0 : i32, i32
  }
}

</mosaic_0001>

<bundles_post_ra>
// kernel: tpu_custom_call.1
= control target key start
LH: loop header
LB: loop body
LE: loop exit
PB: predicated region body
PF: predicated region fallthrough
CT: control target
= control target key end

     0   :  { %8 = vsyncpa [#allocation3], 0  ;;  %s327_s0 = inlined_call_operand.hbm [shape: bf16[16,32], index: 0, kind: input, shape index: {}]   ;;  %s328_s1 = inlined_call_operand.hbm [shape: bf16[32,128], index: 1, kind: input, shape index: {}]   ;;  %s329_s2 = inlined_call_operand.vmem [shape: bf16[1,128], index: 2, kind: input, shape index: {}]   ;;  %s330_s3 = inlined_call_operand.hbm [shape: bf16[16,128], index: 3, kind: output, shape index: {}]  }
   0x1   :  { %9 = vsyncpa [#allocation6], 0 }
   0x2   :  { %10 = vsyncpa [#allocation4], 0  ;;  %s252_s12 = smov [#allocation2]   ;;  %s180_s16 = scalar_lea.hbm %s327_s0, 128 }
   0x3   :  { %s16_s13 = sshll.u32 %s252_s12, 4  ;;  %p181_p0 = scmp.ne.s32.totalorder %s327_s0, %s180_s16  ;;  %s17_s13 = int_to_ptr.vmem [resolvable:$true] %s16_s13 }
   0x4   :  { %p184_p1 = scmp.lt.u32.totalorder %s180_s16, %s327_s0 }
   0x6   :  { %p186_p2 = pnand %p184_p1, %p181_p0 }
   0x8   :  { %189 = shalt.err (!%p186_p2)
}
   0x9   :  { %s190_s21 = scalar_lea.vmem %s17_s13, 128  ;;  %p195_p4 = scmp.lt.s32.totalorder %s17_s13, %s17_s13 }
   0xa   :  { %p191_p3 = scmp.ne.s32.totalorder %s17_s13, %s190_s21  ;;  %p196_p5 = scmp.lt.s32.totalorder %s190_s21, %s190_s21 }
   0xc   :  { %p197_p6 = por %p196_p5, %p195_p4 }
   0xe   :  { %p198_p7 = pnand %p197_p6, %p191_p3 }
  0x10   :  { %201 = shalt.err (!%p198_p7)
}
  0x11   :  { %s253_s22 = smov 64   ;;  %s254_s23 = smov 4  }
  0x12   :  { %22 = dma.hbm_to_vmem [thread:$0]  %s327_s0, 128, %s17_s13, [#allocation3], %s253_s22, %s253_s22, %s254_s23  }
  0x13   :  { %s255_s26 = smov [#allocation5]   ;;  %s202_s30 = scalar_lea.hbm %s328_s1, 256 }
  0x14   :  { %s28_s27 = sshll.u32 %s255_s26, 4  ;;  %p203_p8 = scmp.ne.s32.totalorder %s328_s1, %s202_s30  ;;  %s29_s27 = int_to_ptr.vmem [resolvable:$true] %s28_s27 }
  0x15   :  { %p206_p9 = scmp.lt.u32.totalorder %s202_s30, %s328_s1 }
  0x17   :  { %p208_p10 = pnand %p206_p9, %p203_p8 }
  0x19   :  { %211 = shalt.err (!%p208_p10)
}
  0x1a   :  { %s212_s8 = scalar_lea.vmem %s29_s27, 256  ;;  %p217_p12 = scmp.lt.s32.totalorder %s29_s27, %s29_s27 }
  0x1b   :  { %p213_p11 = scmp.ne.s32.totalorder %s29_s27, %s212_s8  ;;  %p218_p13 = scmp.lt.s32.totalorder %s212_s8, %s212_s8 }
  0x1d   :  { %p219_p0 = por %p218_p13, %p217_p12 }
  0x1f   :  { %p220_p1 = pnand %p219_p0, %p213_p11 }
  0x21   :  { %223 = shalt.err (!%p220_p1)
}
  0x22   :  { %34 = dma.hbm_to_vmem [thread:$0]  %s328_s1, 256, %s29_s27, [#allocation6], %s253_s22, %s253_s22, %s254_s23  }
  0x23   :  { %246 = dma.done.wait [#allocation3], 128  }
  0x24   :  { %247 = vsyncadd [#allocation3], 4294967168 }
  0x25   :  { %248 = dma.done.wait [#allocation6], 256  }
  0x26   :  { %249 = vsyncadd [#allocation6], 4294967040  ;;  %v256_v0 = vmov 0.0   ;;  %vm257_vm0 = vmmov 0   ;;  %v177_v1 = vld [vmem:[#allocation5] sm:$0xff]   ;;  %v178_v2 = vld [vmem:[#allocation5 + $0x8] sm:$0xff]   ;;  %v52_v4 = vlaneseq }
  0x27   :  { %162 = vmatprep.subr.bf16.mxu0 %v256_v0  ;;  %166 = vmatprep.mubr.msk.bf16.mxu0 %vm257_vm0, %v256_v0  ;;  %v179_v3 = vld [vmem:[#allocation2] sm:$0xff]   ;;  %vm73_vm1 = vcmask 261120   ;;  %s258_s11 = smov [#allocation7]  }
  0x28   :  { %163 = vmatpush3.bf16.msra.mxu0 %v177_v1  ;;  %v53_v5 = vshrl.u32 %v52_v4, 7  ;;  %v50_v6 = vld [vmem:[%s329_s2] sm:$0x1]  ;;  %s133_s12 = sshll.u32 %s258_s11, 4  ;;  %s134_s12 = int_to_ptr.vmem [resolvable:$true] %s133_s12 }
  0x29   :  { %164 = vmatprep.subr.bf16.mxu0 %v256_v0  ;;  %v51_v7 = vunpack.c.l.bf16 %v50_v6  ;;  %s224_s13 = scalar_lea.vmem %s134_s12, 128  ;;  %p229_p3 = scmp.lt.s32.totalorder %s134_s12, %s134_s12 }
  0x2a   :  { %v54_v8 = vsub.s32 0, %v53_v5  ;;  %p225_p2 = scmp.ne.s32.totalorder %s134_s12, %s224_s13  ;;  %p230_p4 = scmp.lt.s32.totalorder %s224_s13, %s224_s13 }
  0x2c   :  { %165 = vmatpush3.bf16.msra.mxu0 %v178_v2  ;;  %v55_v9 = vrot.slane %v51_v7, %v54_v8  ;;  %p231_p5 = por %p230_p4, %p229_p3 }
  0x2e   :  { %p232_p6 = pnand %p231_p5, %p225_p2 }
  0x2f   :  { %167 = vmatmul.mubr.msk.bf16.vlgmr.msra.gmra.mrb[0].mxu0 %vm73_vm1, %v179_v3 }
 0x102   :  { %v111_v10 = vpop.f32.mrb[0].mxu0 }
 0x103   :  { %v168_v11 = vpop.f32.mrb[1].mxu0  ;;  %v112_v13 = vadd.f32 %v111_v10, %v55_v9 }
 0x104   :  { %v114_v12 = vpop.f32.mrb[2].mxu0 }
 0x105   :  { %v115_v14 = vadd.f32 %v114_v12, %v55_v9  ;;  %v169_v15 = vpop.f32.mrb[3].mxu0 }
 0x107   :  { %v157_v16 = vpack.c.bf16 %v115_v14, %v112_v13 }
 0x109   :  { %158 = vst [vmem:[#allocation7] sm:$0xff] %v157_v16  }
 0x10a   :  { %235 = shalt.err (!%p232_p6)
}
 0x10b   :  { %s236_s15 = scalar_lea.hbm %s330_s3, 128 }
 0x10c   :  { %p237_p7 = scmp.ne.s32.totalorder %s330_s3, %s236_s15  ;;  %p240_p8 = scmp.lt.u32.totalorder %s236_s15, %s330_s3 }
 0x10e   :  { %p242_p9 = pnand %p240_p8, %p237_p7 }
 0x110   :  { %245 = shalt.err (!%p242_p9)
}
 0x111   :  { %139 = dma.vmem_to_hbm [thread:$0]  %s134_s12, 128, %s330_s3, [#allocation4], %s253_s22, %s253_s22, %s254_s23  }
 0x112   :  { %250 = dma.done.wait [#allocation4], 128  }
 0x113   :  { %251 = vsyncadd [#allocation4], 4294967168 }
 0x114   :  { %143 = vsyncpa [#allocation3], 1 }
 0x115   :  { %144 = vsyncpa [#allocation6], 1 }
 0x116   :  { %145 = vsyncpa [#allocation4], 1 }

</bundles_post_ra>
